<compile_context>
chip_gen: v6e
topology: v6e:2x2x1
jax: 0.10.0
libtpu: 0.0.40
codegen_flags: <defaults>
</compile_context>

<pallas_src>
import functools

import jax
import jax.numpy as jnp
from jax.experimental import pallas as pl
from jax.experimental.pallas import tpu as pltpu


# Column slots inside each head's 128-wide "misc" tile.
_COL_ACT = 0      # sampled action (stored as f32, exact for small ints)
_COL_GREEDY = 1   # argmax action
_COL_LOGG = 2     # log prob of sampled action
_COL_ENT = 3      # sum over (B, d) of (p + 1e-8) * log(p + 1e-8)


def _fused_heads_kernel(dims, DP, x_ref, w_ref, b_ref, g_ref,
                        probs_ref, misc_ref):
    """All action heads in one kernel.

    Inputs (VMEM):
      x_ref : (B, E)      f32  thought vector
      w_ref : (E, H*DP)   f32  per-head weights, zero-padded, concatenated on lanes
      b_ref : (1, H*DP)   f32  per-head biases, zero-padded, concatenated
      g_ref : (B, H*DP)   f32  Gumbel(0,1) noise
    Outputs (VMEM):
      probs_ref : (B, H*DP) f32  softmax probs (padded cols are exactly 0)
      misc_ref  : (B, H*DP) f32  packed act / greedy / logg / entropy per head
    """
    x = x_ref[...]                                               # (B, E)
    # One MXU matmul for every head (lane-concatenated RHS).
    logits_cat = jnp.dot(x, w_ref[...],
                         preferred_element_type=jnp.float32) + b_ref[...]

    B = x.shape[0]
    neg_big = jnp.float32(-1e30)
    col = jax.lax.broadcasted_iota(jnp.int32, (B, DP), 1)

    # Statically unrolled per-head epilogue on 128-aligned lane slices.
    for h, d in enumerate(dims):
        lo = h * DP
        logits = logits_cat[:, lo:lo + DP]
        valid = col < d
        logits = jnp.where(valid, logits, neg_big)

        # masked softmax
        m = jnp.max(logits, axis=-1, keepdims=True)
        e = jnp.exp(logits - m)
        s = jnp.sum(e, axis=-1, keepdims=True)
        probs = e * pl.reciprocal(s, approx=True)
        probs_ref[:, lo:lo + DP] = probs

        # entropy term: sum over valid columns of (p + 1e-8) * log(p + 1e-8)
        p_ = probs + jnp.float32(1e-8)
        ent = jnp.sum(jnp.where(valid, p_ * jnp.log(p_), jnp.float32(0.0)),
                      keepdims=True)                              # (1, 1)

        # greedy argmax: reuse the logits max (softmax is monotone), first index
        greedy = jnp.min(jnp.where(logits == m, col, DP),
                         axis=-1, keepdims=True)                  # (B, 1)

        # Gumbel-max categorical sample (invalid cols already carry -1e30)
        pert = logits + g_ref[:, lo:lo + DP]
        pmx = jnp.max(pert, axis=-1, keepdims=True)
        a = jnp.min(jnp.where(pert == pmx, col, DP),
                    axis=-1, keepdims=True)                       # (B, 1)

        # log prob of sampled action: log_softmax gathered via one-hot mask
        log_probs = logits - m - jnp.log(s)
        logg = jnp.sum(jnp.where(col == a, log_probs, jnp.float32(0.0)),
                       axis=-1, keepdims=True)                    # (B, 1)

        # pack the narrow outputs into one lane-dense tile
        misc = jnp.where(col == _COL_ACT, a.astype(jnp.float32), jnp.float32(0.0))
        misc = jnp.where(col == _COL_GREEDY, greedy.astype(jnp.float32), misc)
        misc = jnp.where(col == _COL_LOGG, logg, misc)
        misc = jnp.where(col == _COL_ENT, ent, misc)
        misc_ref[:, lo:lo + DP] = misc


def _fused_forward(x, w_cat, b_cat, gumbel, dims, DP):
    B, _ = x.shape
    lanes = len(dims) * DP
    kernel = functools.partial(_fused_heads_kernel, tuple(dims), DP)
    vmem = pl.BlockSpec(memory_space=pltpu.MemorySpace.VMEM)
    return pl.pallas_call(
        kernel,
        out_shape=(jax.ShapeDtypeStruct((B, lanes), jnp.float32),   # probs
                   jax.ShapeDtypeStruct((B, lanes), jnp.float32)),  # packed misc
        in_specs=[vmem, vmem, vmem, vmem],
        out_specs=(vmem, vmem),
    )(x, w_cat, b_cat, gumbel)


def init_params(key, embedding_size, action_space):
    """Init mimicking nn.Linear default (uniform +-1/sqrt(fan_in)).

    Weights are zero-padded and lane-concatenated ONCE here (static), so the
    forward pass never rebuilds padded tensors.
    """
    H = len(action_space)
    d_max = max(action_space)
    DP = 128 * ((d_max + 127) // 128)
    bound = 1.0 / (embedding_size ** 0.5)
    W_cat = jnp.zeros((embedding_size, H * DP), jnp.float32)
    b_cat = jnp.zeros((1, H * DP), jnp.float32)
    for h, d in enumerate(action_space):
        key, kw, kb = jax.random.split(key, 3)
        W = jax.random.uniform(kw, (embedding_size, d), jnp.float32, -bound, bound)
        b = jax.random.uniform(kb, (d,), jnp.float32, -bound, bound)
        W_cat = W_cat.at[:, h * DP:h * DP + d].set(W)
        b_cat = b_cat.at[0, h * DP:h * DP + d].set(b)
    return {
        'W_cat': W_cat,
        'b_cat': b_cat,
        'dims': tuple(int(d) for d in action_space),
        'DP': DP,
    }


def stochastic_actions_selector(thought_vector, params, global_idxes,
                                sample_key=None, testing=False):
    """Pallas-backed equivalent of StochasticActionsSelector.forward."""
    B, _ = thought_vector.shape
    dims = params['dims']
    DP = params['DP']
    H = len(dims)

    if sample_key is None:
        sample_key = jax.random.PRNGKey(0)
    gumbel = jax.random.gumbel(sample_key, (B, H * DP), jnp.float32)

    probs_cat, misc = _fused_forward(thought_vector, params['W_cat'],
                                     params['b_cat'], gumbel, dims, DP)

    action_probs_l = []
    elig_idxes_pairs = []
    action_cols = []
    entropy = jnp.float32(0.0)
    matches_argmax_count = jnp.int32(0)
    stochastic_draws_count = 0

    for h, d in enumerate(dims):
        lo = h * DP
        action_probs_l.append(probs_cat[:, lo:lo + d])            # [B, d]
        act = misc[:, lo + _COL_ACT].astype(jnp.int32)            # [B]
        greedy = misc[:, lo + _COL_GREEDY].astype(jnp.int32)      # [B]
        logg = misc[:, lo + _COL_LOGG]                            # [B]
        ent = misc[0, lo + _COL_ENT]                              # scalar

        if testing:
            a_col = greedy
            matches = (greedy[:, None] == greedy[:, None])        # [B,1], all True
            log_g = None
        else:
            a_col = act
            # reproduce the original [B,1] == [B] -> [B,B] broadcast when counting
            matches = (greedy[:, None] == act[None, :])           # [B,B]
            log_g = logg

        matches_argmax_count = matches_argmax_count + jnp.sum(matches.astype(jnp.int32))
        stochastic_draws_count += B
        entropy = entropy - ent          # entropy -= sum((p+eps)*log(p+eps))
        action_cols.append(a_col)
        elig_idxes_pairs.append({'elig': log_g, 'global_idxes': global_idxes})

    actions = jnp.stack(action_cols, axis=1)                      # [B, H] int32
    # TODO(synk): torch returns an int64 LongTensor; int32 used here (x64 disabled in JAX).
    return (action_probs_l, elig_idxes_pairs, actions, entropy,
            (matches_argmax_count, stochastic_draws_count))


if __name__ == "__main__":
    batch_size = 8
    embedding_size = 32
    action_space = (6, 4)

    key = jax.random.PRNGKey(0)
    key, kp, kx, ks = jax.random.split(key, 4)
    params = init_params(kp, embedding_size, action_space)
    thought_vector = jax.random.normal(kx, (batch_size, embedding_size), jnp.float32)
    global_idxes = jnp.arange(batch_size, dtype=jnp.int32)

    (action_probs_l, elig_idxes_pairs, actions, entropy,
     (matches_count, draws_count)) = stochastic_actions_selector(
        thought_vector, params, global_idxes, sample_key=ks, testing=False)

    jax.block_until_ready(actions)
    jax.block_until_ready(entropy)
    for p in action_probs_l:
        jax.block_until_ready(p)
    for pair in elig_idxes_pairs:
        if pair['elig'] is not None:
            jax.block_until_ready(pair['elig'])
    jax.block_until_ready(matches_count)

    print("KERNEL_OK")
</pallas_src>

<mosaic_0001>
module attributes {stable_mosaic.version = 11 : i64} {
  func.func @_fused_heads_kernel(%arg0: memref<8x32xf32, #tpu.memory_space<vmem>>, %arg1: memref<32x256xf32, #tpu.memory_space<vmem>>, %arg2: memref<1x256xf32, #tpu.memory_space<vmem>>, %arg3: memref<8x256xf32, #tpu.memory_space<vmem>>, %arg4: memref<8x256xf32, #tpu.memory_space<vmem>>, %arg5: memref<8x256xf32, #tpu.memory_space<vmem>>) attributes {dimension_semantics = [], scalar_prefetch = 0 : i64, scratch_operands = 0 : i64, tpu.core_type = #tpu.core_type<tc>} {
    %c0 = arith.constant 0 : index
    %c0_0 = arith.constant 0 : index
    %0 = vector.load %arg0[%c0, %c0_0] : memref<8x32xf32, #tpu.memory_space<vmem>>, vector<8x32xf32>
    %c0_1 = arith.constant 0 : index
    %c0_2 = arith.constant 0 : index
    %1 = vector.load %arg1[%c0_1, %c0_2] : memref<32x256xf32, #tpu.memory_space<vmem>>, vector<32x256xf32>
    %cst = arith.constant dense<0.000000e+00> : vector<8x256xf32>
    %2 = tpu.matmul %0, %1, %cst {dimension_numbers = #tpu.dot_dimension_numbers<[1], [0], [0], [1], [0, 0, 1, 1], [], []>} : vector<8x32xf32>, vector<32x256xf32>, vector<8x256xf32> -> vector<8x256xf32>
    %c0_3 = arith.constant 0 : index
    %c0_4 = arith.constant 0 : index
    %3 = vector.load %arg2[%c0_3, %c0_4] : memref<1x256xf32, #tpu.memory_space<vmem>>, vector<1x256xf32>
    %4 = vector.broadcast %3 : vector<1x256xf32> to vector<8x256xf32>
    %5 = arith.addf %2, %4 : vector<8x256xf32>
    %6 = tpu.iota {dimensions = array<i32: 1>} : vector<8x128xi32>
    %7 = vector.extract_strided_slice %5 {offsets = [0, 0], sizes = [8, 128], strides = [1, 1]} : vector<8x256xf32> to vector<8x128xf32>
    %c6_i32 = arith.constant 6 : i32
    %8 = vector.broadcast %c6_i32 : i32 to vector<8x128xi32>
    %9 = arith.cmpi slt, %6, %8 : vector<8x128xi32>
    %cst_5 = arith.constant -1.000000e+30 : f32
    %10 = vector.broadcast %cst_5 : f32 to vector<8x128xf32>
    %11 = arith.select %9, %7, %10 : vector<8x128xi1>, vector<8x128xf32>
    %cst_6 = arith.constant dense<0xFF800000> : vector<8xf32>
    %12 = vector.multi_reduction <maximumf>, %11, %cst_6 [1] : vector<8x128xf32> to vector<8xf32>
    %13 = vector.shape_cast %12 : vector<8xf32> to vector<8x1xf32>
    %14 = vector.broadcast %13 : vector<8x1xf32> to vector<8x128xf32>
    %15 = arith.subf %11, %14 : vector<8x128xf32>
    %16 = math.exp %15 : vector<8x128xf32>
    %cst_7 = arith.constant dense<0.000000e+00> : vector<8xf32>
    %17 = vector.multi_reduction <add>, %16, %cst_7 [1] : vector<8x128xf32> to vector<8xf32>
    %18 = vector.shape_cast %17 : vector<8xf32> to vector<8x1xf32>
    %19 = tpu.reciprocal %18 {approx = true} : vector<8x1xf32> -> vector<8x1xf32>
    %20 = vector.broadcast %19 : vector<8x1xf32> to vector<8x128xf32>
    %21 = arith.mulf %16, %20 : vector<8x128xf32>
    %c0_8 = arith.constant 0 : index
    %c0_9 = arith.constant 0 : index
    %22 = vector.load %arg4[%c0_8, %c0_9] : memref<8x256xf32, #tpu.memory_space<vmem>>, vector<8x128xf32>
    tpu.vector_store %arg4[%c0_8, %c0_9], %21 {strides = array<i32>} : memref<8x256xf32, #tpu.memory_space<vmem>>, vector<8x128xf32>,
    %cst_10 = arith.constant 9.99999993E-9 : f32
    %23 = vector.broadcast %cst_10 : f32 to vector<8x128xf32>
    %24 = arith.addf %21, %23 : vector<8x128xf32>
    %25 = math.log %24 : vector<8x128xf32>
    %26 = arith.mulf %24, %25 : vector<8x128xf32>
    %cst_11 = arith.constant 0.000000e+00 : f32
    %27 = vector.broadcast %cst_11 : f32 to vector<8x128xf32>
    %28 = arith.select %9, %26, %27 : vector<8x128xi1>, vector<8x128xf32>
    %29 = vector.shape_cast %28 : vector<8x128xf32> to vector<1x8x128xf32>
    %cst_12 = arith.constant dense<0.000000e+00> : vector<1xf32>
    %30 = vector.multi_reduction <add>, %29, %cst_12 [1, 2] : vector<1x8x128xf32> to vector<1xf32>
    %31 = vector.shape_cast %30 : vector<1xf32> to vector<1x1x1xf32>
    %32 = vector.extract %31[0, 0, 0] : f32 from vector<1x1x1xf32>
    %33 = vector.broadcast %32 : f32 to vector<1x1xf32>
    %34 = vector.broadcast %13 : vector<8x1xf32> to vector<8x128xf32>
    %35 = arith.cmpf oeq, %11, %34 : vector<8x128xf32>
    %c128_i32 = arith.constant 128 : i32
    %36 = vector.broadcast %c128_i32 : i32 to vector<8x128xi32>
    %37 = arith.select %35, %6, %36 : vector<8x128xi1>, vector<8x128xi32>
    %cst_13 = arith.constant dense<2147483647> : vector<8xi32>
    %38 = vector.multi_reduction <minsi>, %37, %cst_13 [1] : vector<8x128xi32> to vector<8xi32>
    %39 = vector.shape_cast %38 : vector<8xi32> to vector<8x1xi32>
    %c0_14 = arith.constant 0 : index
    %c0_15 = arith.constant 0 : index
    %40 = vector.load %arg3[%c0_14, %c0_15] : memref<8x256xf32, #tpu.memory_space<vmem>>, vector<8x128xf32>
    %41 = arith.addf %11, %40 : vector<8x128xf32>
    %cst_16 = arith.constant dense<0xFF800000> : vector<8xf32>
    %42 = vector.multi_reduction <maximumf>, %41, %cst_16 [1] : vector<8x128xf32> to vector<8xf32>
    %43 = vector.shape_cast %42 : vector<8xf32> to vector<8x1xf32>
    %44 = vector.broadcast %43 : vector<8x1xf32> to vector<8x128xf32>
    %45 = arith.cmpf oeq, %41, %44 : vector<8x128xf32>
    %c128_i32_17 = arith.constant 128 : i32
    %46 = vector.broadcast %c128_i32_17 : i32 to vector<8x128xi32>
    %47 = arith.select %45, %6, %46 : vector<8x128xi1>, vector<8x128xi32>
    %cst_18 = arith.constant dense<2147483647> : vector<8xi32>
    %48 = vector.multi_reduction <minsi>, %47, %cst_18 [1] : vector<8x128xi32> to vector<8xi32>
    %49 = vector.shape_cast %48 : vector<8xi32> to vector<8x1xi32>
    %50 = vector.broadcast %13 : vector<8x1xf32> to vector<8x128xf32>
    %51 = arith.subf %11, %50 : vector<8x128xf32>
    %52 = math.log %18 : vector<8x1xf32>
    %53 = vector.broadcast %52 : vector<8x1xf32> to vector<8x128xf32>
    %54 = arith.subf %51, %53 : vector<8x128xf32>
    %55 = vector.broadcast %49 : vector<8x1xi32> to vector<8x128xi32>
    %56 = arith.cmpi eq, %6, %55 : vector<8x128xi32>
    %cst_19 = arith.constant 0.000000e+00 : f32
    %57 = vector.broadcast %cst_19 : f32 to vector<8x128xf32>
    %58 = arith.select %56, %54, %57 : vector<8x128xi1>, vector<8x128xf32>
    %cst_20 = arith.constant dense<0.000000e+00> : vector<8xf32>
    %59 = vector.multi_reduction <add>, %58, %cst_20 [1] : vector<8x128xf32> to vector<8xf32>
    %60 = vector.shape_cast %59 : vector<8xf32> to vector<8x1xf32>
    %c0_i32 = arith.constant 0 : i32
    %61 = vector.broadcast %c0_i32 : i32 to vector<8x128xi32>
    %62 = arith.cmpi eq, %6, %61 : vector<8x128xi32>
    %63 = arith.sitofp %49 : vector<8x1xi32> to vector<8x1xf32>
    %cst_21 = arith.constant 0.000000e+00 : f32
    %64 = vector.shape_cast %63 : vector<8x1xf32> to vector<8x1xf32>
    %65 = vector.broadcast %64 : vector<8x1xf32> to vector<8x128xf32>
    %66 = vector.broadcast %cst_21 : f32 to vector<8x128xf32>
    %67 = arith.select %62, %65, %66 : vector<8x128xi1>, vector<8x128xf32>
    %c1_i32 = arith.constant 1 : i32
    %68 = vector.broadcast %c1_i32 : i32 to vector<8x128xi32>
    %69 = arith.cmpi eq, %6, %68 : vector<8x128xi32>
    %70 = arith.sitofp %39 : vector<8x1xi32> to vector<8x1xf32>
    %71 = vector.shape_cast %70 : vector<8x1xf32> to vector<8x1xf32>
    %72 = vector.broadcast %71 : vector<8x1xf32> to vector<8x128xf32>
    %73 = arith.select %69, %72, %67 : vector<8x128xi1>, vector<8x128xf32>
    %c2_i32 = arith.constant 2 : i32
    %74 = vector.broadcast %c2_i32 : i32 to vector<8x128xi32>
    %75 = arith.cmpi eq, %6, %74 : vector<8x128xi32>
    %76 = vector.shape_cast %60 : vector<8x1xf32> to vector<8x1xf32>
    %77 = vector.broadcast %76 : vector<8x1xf32> to vector<8x128xf32>
    %78 = arith.select %75, %77, %73 : vector<8x128xi1>, vector<8x128xf32>
    %c3_i32 = arith.constant 3 : i32
    %79 = vector.broadcast %c3_i32 : i32 to vector<8x128xi32>
    %80 = arith.cmpi eq, %6, %79 : vector<8x128xi32>
    %81 = vector.shape_cast %33 : vector<1x1xf32> to vector<1x1xf32>
    %82 = vector.broadcast %81 : vector<1x1xf32> to vector<8x128xf32>
    %83 = arith.select %80, %82, %78 : vector<8x128xi1>, vector<8x128xf32>
    %c0_22 = arith.constant 0 : index
    %c0_23 = arith.constant 0 : index
    %84 = vector.load %arg5[%c0_22, %c0_23] : memref<8x256xf32, #tpu.memory_space<vmem>>, vector<8x128xf32>
    tpu.vector_store %arg5[%c0_22, %c0_23], %83 {strides = array<i32>} : memref<8x256xf32, #tpu.memory_space<vmem>>, vector<8x128xf32>,
    %85 = vector.extract_strided_slice %5 {offsets = [0, 128], sizes = [8, 128], strides = [1, 1]} : vector<8x256xf32> to vector<8x128xf32>
    %c4_i32 = arith.constant 4 : i32
    %86 = vector.broadcast %c4_i32 : i32 to vector<8x128xi32>
    %87 = arith.cmpi slt, %6, %86 : vector<8x128xi32>
    %cst_24 = arith.constant -1.000000e+30 : f32
    %88 = vector.broadcast %cst_24 : f32 to vector<8x128xf32>
    %89 = arith.select %87, %85, %88 : vector<8x128xi1>, vector<8x128xf32>
    %cst_25 = arith.constant dense<0xFF800000> : vector<8xf32>
    %90 = vector.multi_reduction <maximumf>, %89, %cst_25 [1] : vector<8x128xf32> to vector<8xf32>
    %91 = vector.shape_cast %90 : vector<8xf32> to vector<8x1xf32>
    %92 = vector.broadcast %91 : vector<8x1xf32> to vector<8x128xf32>
    %93 = arith.subf %89, %92 : vector<8x128xf32>
    %94 = math.exp %93 : vector<8x128xf32>
    %cst_26 = arith.constant dense<0.000000e+00> : vector<8xf32>
    %95 = vector.multi_reduction <add>, %94, %cst_26 [1] : vector<8x128xf32> to vector<8xf32>
    %96 = vector.shape_cast %95 : vector<8xf32> to vector<8x1xf32>
    %97 = tpu.reciprocal %96 {approx = true} : vector<8x1xf32> -> vector<8x1xf32>
    %98 = vector.broadcast %97 : vector<8x1xf32> to vector<8x128xf32>
    %99 = arith.mulf %94, %98 : vector<8x128xf32>
    %c0_27 = arith.constant 0 : index
    %c128 = arith.constant 128 : index
    %100 = vector.load %arg4[%c0_27, %c128] : memref<8x256xf32, #tpu.memory_space<vmem>>, vector<8x128xf32>
    tpu.vector_store %arg4[%c0_27, %c128], %99 {strides = array<i32>} : memref<8x256xf32, #tpu.memory_space<vmem>>, vector<8x128xf32>,
    %cst_28 = arith.constant 9.99999993E-9 : f32
    %101 = vector.broadcast %cst_28 : f32 to vector<8x128xf32>
    %102 = arith.addf %99, %101 : vector<8x128xf32>
    %103 = math.log %102 : vector<8x128xf32>
    %104 = arith.mulf %102, %103 : vector<8x128xf32>
    %cst_29 = arith.constant 0.000000e+00 : f32
    %105 = vector.broadcast %cst_29 : f32 to vector<8x128xf32>
    %106 = arith.select %87, %104, %105 : vector<8x128xi1>, vector<8x128xf32>
    %107 = vector.shape_cast %106 : vector<8x128xf32> to vector<1x8x128xf32>
    %cst_30 = arith.constant dense<0.000000e+00> : vector<1xf32>
    %108 = vector.multi_reduction <add>, %107, %cst_30 [1, 2] : vector<1x8x128xf32> to vector<1xf32>
    %109 = vector.shape_cast %108 : vector<1xf32> to vector<1x1x1xf32>
    %110 = vector.extract %109[0, 0, 0] : f32 from vector<1x1x1xf32>
    %111 = vector.broadcast %110 : f32 to vector<1x1xf32>
    %112 = vector.broadcast %91 : vector<8x1xf32> to vector<8x128xf32>
    %113 = arith.cmpf oeq, %89, %112 : vector<8x128xf32>
    %c128_i32_31 = arith.constant 128 : i32
    %114 = vector.broadcast %c128_i32_31 : i32 to vector<8x128xi32>
    %115 = arith.select %113, %6, %114 : vector<8x128xi1>, vector<8x128xi32>
    %cst_32 = arith.constant dense<2147483647> : vector<8xi32>
    %116 = vector.multi_reduction <minsi>, %115, %cst_32 [1] : vector<8x128xi32> to vector<8xi32>
    %117 = vector.shape_cast %116 : vector<8xi32> to vector<8x1xi32>
    %c0_33 = arith.constant 0 : index
    %c128_34 = arith.constant 128 : index
    %118 = vector.load %arg3[%c0_33, %c128_34] : memref<8x256xf32, #tpu.memory_space<vmem>>, vector<8x128xf32>
    %119 = arith.addf %89, %118 : vector<8x128xf32>
    %cst_35 = arith.constant dense<0xFF800000> : vector<8xf32>
    %120 = vector.multi_reduction <maximumf>, %119, %cst_35 [1] : vector<8x128xf32> to vector<8xf32>
    %121 = vector.shape_cast %120 : vector<8xf32> to vector<8x1xf32>
    %122 = vector.broadcast %121 : vector<8x1xf32> to vector<8x128xf32>
    %123 = arith.cmpf oeq, %119, %122 : vector<8x128xf32>
    %c128_i32_36 = arith.constant 128 : i32
    %124 = vector.broadcast %c128_i32_36 : i32 to vector<8x128xi32>
    %125 = arith.select %123, %6, %124 : vector<8x128xi1>, vector<8x128xi32>
    %cst_37 = arith.constant dense<2147483647> : vector<8xi32>
    %126 = vector.multi_reduction <minsi>, %125, %cst_37 [1] : vector<8x128xi32> to vector<8xi32>
    %127 = vector.shape_cast %126 : vector<8xi32> to vector<8x1xi32>
    %128 = vector.broadcast %91 : vector<8x1xf32> to vector<8x128xf32>
    %129 = arith.subf %89, %128 : vector<8x128xf32>
    %130 = math.log %96 : vector<8x1xf32>
    %131 = vector.broadcast %130 : vector<8x1xf32> to vector<8x128xf32>
    %132 = arith.subf %129, %131 : vector<8x128xf32>
    %133 = vector.broadcast %127 : vector<8x1xi32> to vector<8x128xi32>
    %134 = arith.cmpi eq, %6, %133 : vector<8x128xi32>
    %cst_38 = arith.constant 0.000000e+00 : f32
    %135 = vector.broadcast %cst_38 : f32 to vector<8x128xf32>
    %136 = arith.select %134, %132, %135 : vector<8x128xi1>, vector<8x128xf32>
    %cst_39 = arith.constant dense<0.000000e+00> : vector<8xf32>
    %137 = vector.multi_reduction <add>, %136, %cst_39 [1] : vector<8x128xf32> to vector<8xf32>
    %138 = vector.shape_cast %137 : vector<8xf32> to vector<8x1xf32>
    %c0_i32_40 = arith.constant 0 : i32
    %139 = vector.broadcast %c0_i32_40 : i32 to vector<8x128xi32>
    %140 = arith.cmpi eq, %6, %139 : vector<8x128xi32>
    %141 = arith.sitofp %127 : vector<8x1xi32> to vector<8x1xf32>
    %cst_41 = arith.constant 0.000000e+00 : f32
    %142 = vector.shape_cast %141 : vector<8x1xf32> to vector<8x1xf32>
    %143 = vector.broadcast %142 : vector<8x1xf32> to vector<8x128xf32>
    %144 = vector.broadcast %cst_41 : f32 to vector<8x128xf32>
    %145 = arith.select %140, %143, %144 : vector<8x128xi1>, vector<8x128xf32>
    %c1_i32_42 = arith.constant 1 : i32
    %146 = vector.broadcast %c1_i32_42 : i32 to vector<8x128xi32>
    %147 = arith.cmpi eq, %6, %146 : vector<8x128xi32>
    %148 = arith.sitofp %117 : vector<8x1xi32> to vector<8x1xf32>
    %149 = vector.shape_cast %148 : vector<8x1xf32> to vector<8x1xf32>
    %150 = vector.broadcast %149 : vector<8x1xf32> to vector<8x128xf32>
    %151 = arith.select %147, %150, %145 : vector<8x128xi1>, vector<8x128xf32>
    %c2_i32_43 = arith.constant 2 : i32
    %152 = vector.broadcast %c2_i32_43 : i32 to vector<8x128xi32>
    %153 = arith.cmpi eq, %6, %152 : vector<8x128xi32>
    %154 = vector.shape_cast %138 : vector<8x1xf32> to vector<8x1xf32>
    %155 = vector.broadcast %154 : vector<8x1xf32> to vector<8x128xf32>
    %156 = arith.select %153, %155, %151 : vector<8x128xi1>, vector<8x128xf32>
    %c3_i32_44 = arith.constant 3 : i32
    %157 = vector.broadcast %c3_i32_44 : i32 to vector<8x128xi32>
    %158 = arith.cmpi eq, %6, %157 : vector<8x128xi32>
    %159 = vector.shape_cast %111 : vector<1x1xf32> to vector<1x1xf32>
    %160 = vector.broadcast %159 : vector<1x1xf32> to vector<8x128xf32>
    %161 = arith.select %158, %160, %156 : vector<8x128xi1>, vector<8x128xf32>
    %c0_45 = arith.constant 0 : index
    %c128_46 = arith.constant 128 : index
    %162 = vector.load %arg5[%c0_45, %c128_46] : memref<8x256xf32, #tpu.memory_space<vmem>>, vector<8x128xf32>
    tpu.vector_store %arg5[%c0_45, %c128_46], %161 {strides = array<i32>} : memref<8x256xf32, #tpu.memory_space<vmem>>, vector<8x128xf32>,
    return
  }
}

</mosaic_0001>

<bundles_post_ra>
// kernel: tpu_custom_call.1
= control target key start
LH: loop header
LB: loop body
LE: loop exit
PB: predicated region body
PF: predicated region fallthrough
CT: control target
= control target key end

     0   :  { %11 = vsyncpa [#allocation3], 0  ;;  %s595_s0 = inlined_call_operand.hbm [shape: f32[8,32], index: 0, kind: input, shape index: {}]   ;;  %s596_s1 = inlined_call_operand.hbm [shape: f32[32,256], index: 1, kind: input, shape index: {}]   ;;  %s597_s2 = inlined_call_operand.vmem [shape: f32[1,256], index: 2, kind: input, shape index: {}]   ;;  %s598_s3 = inlined_call_operand.hbm [shape: f32[8,256], index: 3, kind: input, shape index: {}]   ;;  %s599_s4 = inlined_call_operand.hbm [shape: f32[8,256], index: 4, kind: output, shape index: {0}]   ;;  %s600_s5 = inlined_call_operand.hbm [shape: f32[8,256], index: 5, kind: output, shape index: {1}]  }
   0x1   :  { %12 = vsyncpa [#allocation6], 0 }
   0x2   :  { %13 = vsyncpa [#allocation4], 0 }
   0x3   :  { %14 = vsyncpa [#allocation10], 0  ;;  %s481_s18 = smov [#allocation5]  }
   0x4   :  { %s30_s19 = sshll.u32 %s481_s18, 4  ;;  %s31_s19 = int_to_ptr.vmem [resolvable:$true] %s30_s19 }
   0x5   :  { %s381_s20 = scalar_lea.vmem %s31_s19, 1024  ;;  %p386_p1 = scmp.lt.s32.totalorder %s31_s19, %s31_s19 }
   0x6   :  { %p382_p0 = scmp.ne.s32.totalorder %s31_s19, %s381_s20  ;;  %p387_p2 = scmp.lt.s32.totalorder %s381_s20, %s381_s20 }
   0x8   :  { %p388_p3 = por %p387_p2, %p386_p1 }
   0xa   :  { %p389_p4 = pnand %p388_p3, %p382_p0 }
   0xc   :  { %392 = shalt.err (!%p389_p4)
}
   0xd   :  { %s482_s21 = smov 256   ;;  %s483_s22 = smov 16  }
   0xe   :  { %36 = dma.hbm_to_vmem [thread:$0]  %s596_s1, 1024, %s31_s19, [#allocation6], %s482_s21, %s482_s21, %s483_s22  }
   0xf   :  { %s484_s25 = smov [#allocation2]   ;;  %s485_s27 = smov [#allocation7]  }
  0x10   :  { %s21_s26 = sshll.u32 %s484_s25, 4  ;;  %s45_s28 = sshll.u32 %s485_s27, 4  ;;  %s22_s26 = int_to_ptr.vmem [resolvable:$true] %s21_s26  ;;  %s46_s28 = int_to_ptr.vmem [resolvable:$true] %s45_s28 }
  0x11   :  { %s401_s29 = scalar_lea.vmem %s22_s26, 128  ;;  %p406_p6 = scmp.lt.s32.totalorder %s22_s26, %s22_s26 }
  0x12   :  { %p402_p5 = scmp.ne.s32.totalorder %s22_s26, %s401_s29  ;;  %p407_p7 = scmp.lt.s32.totalorder %s401_s29, %s401_s29 }
  0x14   :  { %p408_p8 = por %p407_p7, %p406_p6 }
  0x16   :  { %p409_p9 = pnand %p408_p8, %p402_p5 }
  0x18   :  { %412 = shalt.err (!%p409_p9)
}
  0x19   :  { %24 = dma.hbm_to_vmem [thread:$0]  %s595_s0, 128, %s22_s26, [#allocation3]  }
  0x1a   :  { %s421_s7 = scalar_lea.vmem %s46_s28, 256  ;;  %p426_p11 = scmp.lt.s32.totalorder %s46_s28, %s46_s28 }
  0x1b   :  { %p422_p10 = scmp.ne.s32.totalorder %s46_s28, %s421_s7  ;;  %p427_p12 = scmp.lt.s32.totalorder %s421_s7, %s421_s7 }
  0x1d   :  { %p428_p13 = por %p427_p12, %p426_p11 }
  0x1f   :  { %p429_p0 = pnand %p428_p13, %p422_p10 }
  0x21   :  { %432 = shalt.err (!%p429_p0)
}
  0x22   :  { %48 = dma.hbm_to_vmem [thread:$0]  %s598_s3, 256, %s46_s28, [#allocation6]  }
  0x23   :  { %473 = dma.done.wait [#allocation3], 128  }
  0x24   :  { %474 = vsyncadd [#allocation3], 4294967168 }
  0x25   :  { %475 = dma.done.wait [#allocation6], 1280  }
  0x26   :  { %476 = vsyncadd [#allocation6], 4294966016  ;;  %v486_v0 = vmov 0.0   ;;  %v66_v1 = vld [vmem:[#allocation5 + $0x38] sm:$0xff]  ;;  %v65_v2 = vld [vmem:[#allocation5 + $0x30] sm:$0xff]  ;;  %vm79_vm0 = vcmask 261120   ;;  %v69_v10 = vlaneseq }
  0x27   :  { %147 = vmatprep.mubr.f32.mxu0 %v486_v0  ;;  %v64_v3 = vld [vmem:[#allocation5 + $0x28] sm:$0xff]  ;;  %107 = vmatprep.subr.mxu0 %v66_v1  ;;  %v63_v4 = vld [vmem:[#allocation5 + $0x20] sm:$0xff]  ;;  %v62_v5 = vld [vmem:[#allocation5 + $0x18] sm:$0xff] }
  0x28   :  { %108 = vmatpush1.msra.mxu0 %v65_v2  ;;  %v61_v6 = vld [vmem:[#allocation5 + $0x10] sm:$0xff]  ;;  %v60_v7 = vld [vmem:[#allocation5 + $0x8] sm:$0xff]  ;;  %v59_v8 = vld [vmem:[#allocation5] sm:$0xff]  ;;  %v70_v11 = vshrl.u32 %v69_v10, 7  ;;  %v531_v15 = vand.u32 127, %v69_v10 }
  0x29   :  { %109 = vmatprep.subr.mxu0 %v64_v3  ;;  %v58_v9 = vld [vmem:[#allocation2] sm:$0xff]  ;;  %v198_v20 = vld [vmem:[#allocation7] sm:$0xff]  ;;  %v279_v26 = vld [vmem:[#allocation7 + $0x8] sm:$0xff] }
  0x2a   :  { %110 = vmatpush1.msra.mxu0 %v63_v4  ;;  %v71_v12 = vsub.s32 0, %v70_v11  ;;  %v67_v13 = vld [vmem:[%s597_s2] sm:$0x3]  ;;  %v75_v14 = vsub.s32 1, %v70_v11  ;;  %vm156_vm1 = vcmp.lt.s32.totalorder %v531_v15, 6  ;;  %vm237_vm2 = vcmp.lt.s32.totalorder %v531_v15, 4 }
  0x2b   :  { %111 = vmatprep.subr.mxu0 %v62_v5  ;;  %s487_s2 = smov [#allocation8]  }
  0x2c   :  { %112 = vmatpush1.msra.mxu0 %v61_v6  ;;  %v72_v16 = vrot.slane %v67_v13, %v71_v12  ;;  %v76_v17 = vrot.slane %v67_v13, %v75_v14  ;;  %s320_s9 = sshll.u32 %s487_s2, 4  ;;  %s321_s9 = int_to_ptr.vmem [resolvable:$true] %s320_s9 }
  0x2d   :  { %113 = vmatprep.subr.mxu0 %v60_v7  ;;  %s433_s10 = scalar_lea.vmem %s321_s9, 256  ;;  %p438_p2 = scmp.lt.s32.totalorder %s321_s9, %s321_s9 }
  0x2e   :  { %114 = vmatpush1.msra.mxu0 %v59_v8  ;;  %p434_p1 = scmp.ne.s32.totalorder %s321_s9, %s433_s10  ;;  %p439_p3 = scmp.lt.s32.totalorder %s433_s10, %s433_s10 }
  0x2f   :  { %344 = vmatmul.mubr.msk.f32.vlgmr.msra.gmra.mxu0 %vm79_vm0, %v58_v9 }
  0x30   :  { %p440_p4 = por %p439_p3, %p438_p2 }
  0x32   :  { %p441_p5 = pnand %p440_p4, %p434_p1 }
  0xef   :  { %v149_v18 = vpop.f32.mrf.mxu0 }
  0xf0   :  { %v150_v19 = vadd.f32 %v149_v18, %v72_v16 }
  0xf1   :  { %v151_v21 = vpop.f32.mrf.mxu0 }
  0xf2   :  { %v157_v22 = vsel %vm156_vm1, %v150_v19, -1e+30  ;;  %v152_v23 = vadd.f32 %v151_v21, %v76_v17 }
  0xf3   :  { %158 = vmax.xlane.f32.xlu0 %v157_v22  ;;  %v199_v24 = vadd.f32 %v198_v20, %v157_v22 }
  0xf4   :  { %v238_v25 = vsel %vm237_vm2, %v152_v23, -1e+30 }
  0xf5   :  { %200 = vmax.xlane.f32.xlu1 %v199_v24  ;;  %v280_v27 = vadd.f32 %v279_v26, %v238_v25 }
  0xf7   :  { %239 = vmax.xlane.f32.xlu0 %v238_v25 }
  0xf9   :  { %281 = vmax.xlane.f32.xlu1 %v280_v27 }
 0x17c   :  { %v159_v28 = vpop.xlane.xlu0 %158 }
 0x17d   :  { %v539_v29 = vsub.f32 %v157_v22, %v159_v28  ;;  %vm182_vm4 = vcmp.eq.f32.partialorder %v157_v22, %v159_v28 }
 0x17e   :  { %v201_v33 = vpop.xlane.xlu1 %200  ;;  %v183_v39 = vsel %vm182_vm4, %v531_v15, 128 }
 0x17f   :  { %v161_v30 = vmul.f32 1.442695, %v539_v29  ;;  %vm202_vm3 = vcmp.eq.f32.partialorder %v199_v24, %v201_v33  ;;  %v185_v42 = vshra.s32 %v183_v39, 16  ;;  %v184_v6 = vand.u32 65535, %v183_v39 }
 0x180   :  { %v240_v31 = vpop.xlane.xlu0 %239  ;;  %v203_v36 = vsel %vm202_vm3, %v531_v15, 128 }
 0x181   :  { %357 = vpow2.f32 %v161_v30  ;;  %v542_v32 = vsub.f32 %v238_v25, %v240_v31  ;;  %v205_v37 = vshra.s32 %v203_v36, 16  ;;  %vm263_vm6 = vcmp.eq.f32.partialorder %v238_v25, %v240_v31 }
 0x182   :  { %v282_v35 = vpop.xlane.xlu1 %281  ;;  %v264_v45 = vsel %vm263_vm6, %v531_v15, 128  ;;  %v187_v46 = vcvt.s32.f32 %v185_v42  ;;  %v204_v50 = vand.u32 65535, %v203_v36  ;;  %v186_v11 = vcvt.s32.f32 %v184_v6 }
 0x183   :  { %v242_v34 = vmul.f32 1.442695, %v542_v32  ;;  %vm283_vm5 = vcmp.eq.f32.partialorder %v280_v27, %v282_v35  ;;  %v207_v41 = vcvt.s32.f32 %v205_v37  ;;  %v266_v48 = vshra.s32 %v264_v45, 16 }
 0x184   :  { %v284_v40 = vsel %vm283_vm5, %v531_v15, 128  ;;  %v206_v55 = vcvt.s32.f32 %v204_v50  ;;  %v265_v13 = vand.u32 65535, %v264_v45 }
 0x185   :  { %359 = vpow2.f32 %v242_v34  ;;  %v286_v43 = vshra.s32 %v284_v40, 16  ;;  %v268_v49 = vcvt.s32.f32 %v266_v48  ;;  %v285_v52 = vand.u32 65535, %v284_v40 }
 0x186   :  { %v267_v17 = vcvt.s32.f32 %v265_v13 }
 0x187   :  { %v288_v47 = vcvt.s32.f32 %v286_v43  ;;  %v287_v58 = vcvt.s32.f32 %v285_v52 }
 0x18e   :  { %v358_v38 = vpop.eup %357 }
 0x18f   :  { %163 = vadd.xlane.f32.xlu0 %v358_v38 }
 0x192   :  { %v360_v44 = vpop.eup %359 }
 0x193   :  { %244 = vadd.xlane.f32.xlu1 %v360_v44  ;;  %208 = vmin.xlane.f32.xlu0 %v207_v41 }
 0x197   :  { %188 = vmin.xlane.f32.xlu0 %v187_v46  ;;  %289 = vmin.xlane.f32.xlu1 %v288_v47 }
 0x19b   :  { %269 = vmin.xlane.f32.xlu1 %v268_v49 }
 0x218   :  { %v164_v51 = vpop.xlane.xlu0 %163 }
 0x219   :  { %361 = vrcp.f32 %v164_v51 }
 0x21c   :  { %v209_v53 = vpop.xlane.xlu0 %208  ;;  %v245_v54 = vpop.xlane.xlu1 %244 }
 0x21d   :  { %363 = vrcp.f32 %v245_v54  ;;  %vm210_vm7 = vcmp.eq.f32.partialorder %v207_v41, %v209_v53  ;;  %v215_v20 = vcvt.f32.s32 %v209_v53 }
 0x21e   :  { %v211_v56 = vsel %vm210_vm7, %v206_v55, inf }
 0x21f   :  { %212 = vmin.xlane.f32.xlu0 %v211_v56  ;;  %v216_v24 = vshll.u32 %v215_v20, 16 }
 0x220   :  { %v290_v57 = vpop.xlane.xlu1 %289  ;;  %v549_v4 = vpop.xlane.xlu0 %188 }
 0x221   :  { %vm291_vm8 = vcmp.eq.f32.partialorder %v288_v47, %v290_v57  ;;  %vm190_vm9 = vcmp.eq.f32.partialorder %v187_v46, %v549_v4  ;;  %v296_v25 = vcvt.f32.s32 %v290_v57 }
 0x222   :  { %v292_v59 = vsel %vm291_vm8, %v287_v58, inf  ;;  %v191_v14 = vsel %vm190_vm9, %v186_v11, inf }
 0x223   :  { %293 = vmin.xlane.f32.xlu1 %v292_v59  ;;  %v297_v33 = vshll.u32 %v296_v25, 16 }
 0x224   :  { %v554_v10 = vpop.xlane.xlu1 %269 }
 0x225   :  { %vm271_vm10 = vcmp.eq.f32.partialorder %v268_v49, %v554_v10 }
 0x226   :  { %v362_v60 = vpop.eup %361  ;;  %v272_v18 = vsel %vm271_vm10, %v267_v17, inf }
 0x227   :  { %v166_v61 = vmul.f32 %v362_v60, %v358_v38 }
 0x229   :  { %v168_v62 = vadd.f32 1e-08, %v166_v61  ;;  %167 = vst [vmem:[#allocation8] sm:$0xff] %v166_v61 }
 0x22a   :  { %v364_v63 = vpop.eup %363 }
 0x22b   :  { %365 = vlog2.f32 %v168_v62  ;;  %v247_v0 = vmul.f32 %v364_v63, %v360_v44 }
 0x22d   :  { %v249_v1 = vadd.f32 1e-08, %v247_v0  ;;  %248 = vst [vmem:[#allocation8 + $0x8] sm:$0xff] %v247_v0 }
 0x22f   :  { %367 = vlog2.f32 %v249_v1 }
 0x230   :  { %369 = vlog2.f32 %v164_v51 }
 0x231   :  { %371 = vlog2.f32 %v245_v54 }
 0x238   :  { %v366_v2 = vpop.eup %365 }
 0x239   :  { %v170_v3 = vmul.f32 0.6931472, %v366_v2 }
 0x23b   :  { %v171_v5 = vmul.f32 %v170_v3, %v168_v62 }
 0x23c   :  { %v368_v7 = vpop.eup %367 }
 0x23d   :  { %v172_v8 = vsel %vm156_vm1, %v171_v5, 0.0  ;;  %v251_v9 = vmul.f32 0.6931472, %v368_v7  ;;  %v370_v19 = vpop.eup %369 }
 0x23e   :  { %173 = vadd.xlane.f32.xlu0 %v172_v8  ;;  %v219_v22 = vmul.f32 0.6931472, %v370_v19  ;;  %v372_v23 = vpop.eup %371 }
 0x23f   :  { %v252_v12 = vmul.f32 %v251_v9, %v249_v1  ;;  %v300_v31 = vmul.f32 0.6931472, %v372_v23 }
 0x240   :  { %v220_v30 = vsub.f32 %v539_v29, %v219_v22 }
 0x241   :  { %v253_v16 = vsel %vm237_vm2, %v252_v12, 0.0  ;;  %v301_v37 = vsub.f32 %v542_v32, %v300_v31 }
 0x242   :  { %192 = vmin.xlane.f32.xlu0 %v191_v14  ;;  %254 = vadd.xlane.f32.xlu1 %v253_v16 }
 0x246   :  { %273 = vmin.xlane.f32.xlu1 %v272_v18 }
 0x2a8   :  { %v213_v21 = vpop.xlane.xlu0 %212 }
 0x2a9   :  { %v214_v26 = vcvt.f32.s32 %v213_v21 }
 0x2ab   :  { %v217_v27 = vadd.s32 %v216_v24, %v214_v26 }
 0x2ac   :  { %v294_v28 = vpop.xlane.xlu1 %293 }
 0x2ad   :  { %v295_v34 = vcvt.f32.s32 %v294_v28  ;;  %vm221_vm11 = vcmp.eq.s32.totalorder %v531_v15, %v217_v27 }
 0x2ae   :  { %v222_v35 = vsel %vm221_vm11, %v220_v30, 0.0 }
 0x2af   :  { %v561_v36 = vadd.s32 %v297_v33, %v295_v34  ;;  %223 = vadd.xlane.f32.xlu0 %v222_v35 }
 0x2b1   :  { %vm302_vm12 = vcmp.eq.s32.totalorder %v531_v15, %v561_v36 }
 0x2b2   :  { %v303_v38 = vsel %vm302_vm12, %v301_v37, 0.0 }
 0x2b3   :  { %304 = vadd.xlane.f32.xlu1 %v303_v38 }
 0x2b4   :  { %444 = shalt.err (!%p441_p5)
}
 0x2b5   :  { %323 = dma.vmem_to_hbm [thread:$0]  %s321_s9, 256, %s599_s4, [#allocation4]   ;;  %v195_v52 = vcvt.f32.s32 %v549_v4  ;;  %v276_v56 = vcvt.f32.s32 %v554_v10  ;;  %v226_v60 = vcvt.s32.f32 %v217_v27  ;;  %vm225_vm13 = vcmp.eq.s32.totalorder %v531_v15, 0 }
 0x2b6   :  { %vm228_vm14 = vcmp.eq.s32.totalorder %v531_v15, 1  ;;  %vm231_vm15 = vcmp.eq.s32.totalorder %v531_v15, 2  ;;  %v306_v63 = vcvt.s32.f32 %v561_v36  ;;  %vm233_vm0 = vcmp.eq.s32.totalorder %v531_v15, 3  ;;  %s488_s14 = smov [#allocation9]  }
 0x2b7   :  { %v196_v55 = vshll.u32 %v195_v52, 16  ;;  %v277_v59 = vshll.u32 %v276_v56, 16  ;;  %v227_v0 = vsel %vm225_vm13, %v226_v60, 0.0  ;;  %s330_s15 = sshll.u32 %s488_s14, 4  ;;  %s331_s15 = int_to_ptr.vmem [resolvable:$true] %s330_s15 }
 0x2b8   :  { %v307_v7 = vsel %vm225_vm13, %v306_v63, 0.0  ;;  %s453_s16 = scalar_lea.vmem %s331_s15, 256  ;;  %p458_p7 = scmp.lt.s32.totalorder %s331_s15, %s331_s15 }
 0x2b9   :  { %p454_p6 = scmp.ne.s32.totalorder %s331_s15, %s453_s16  ;;  %p459_p8 = scmp.lt.s32.totalorder %s453_s16, %s453_s16 }
 0x2bb   :  { %p460_p9 = por %p459_p8, %p458_p7 }
 0x2bd   :  { %p461_p10 = pnand %p460_p9, %p454_p6 }
 0x2c7   :  { %v174_v29 = vpop.xlane.xlu0 %173 }
 0x2c8   :  { %v175_v32 = vrot.slane %v174_v29, 4 }
 0x2ca   :  { %v176_v39 = vadd.f32 %v175_v32, %v174_v29 }
 0x2cb   :  { %v255_v40 = vpop.xlane.xlu1 %254  ;;  %v193_v51 = vpop.xlane.xlu0 %192 }
 0x2cc   :  { %v177_v41 = vrot.slane %v176_v39, 2  ;;  %v256_v42 = vrot.slane %v255_v40, 4  ;;  %v194_v53 = vcvt.f32.s32 %v193_v51 }
 0x2ce   :  { %v257_v43 = vadd.f32 %v256_v42, %v255_v40  ;;  %v178_v44 = vadd.f32 %v177_v41, %v176_v39  ;;  %v197_v57 = vadd.s32 %v196_v55, %v194_v53 }
 0x2cf   :  { %v274_v54 = vpop.xlane.xlu1 %273 }
 0x2d0   :  { %v258_v45 = vrot.slane %v257_v43, 2  ;;  %v179_v46 = vrot.slane %v178_v44, 1  ;;  %v275_v58 = vcvt.f32.s32 %v274_v54  ;;  %v229_v61 = vcvt.s32.f32 %v197_v57 }
 0x2d2   :  { %v180_v47 = vadd.f32 %v179_v46, %v178_v44  ;;  %v259_v48 = vadd.f32 %v258_v45, %v257_v43  ;;  %v278_v62 = vadd.s32 %v277_v59, %v275_v58  ;;  %v230_v2 = vsel %vm228_vm14, %v229_v61, %v227_v0 }
 0x2d4   :  { %345 = vpush %v180_v47  ;;  %v260_v49 = vrot.slane %v259_v48, 1  ;;  %v308_v1 = vcvt.s32.f32 %v278_v62 }
 0x2d6   :  { %v261_v50 = vadd.f32 %v260_v49, %v259_v48  ;;  %v309_v8 = vsel %vm228_vm14, %v308_v1, %v307_v7 }
 0x2d8   :  { %347 = vpush %v261_v50 }
 0x305   :  { %s346_s4 = spop %345 }
 0x306   :  { %v234_v4 = vstv %s346_s4 }
 0x309   :  { %s348_s13 = spop %347 }
 0x30a   :  { %v311_v10 = vstv %s348_s13 }
 0x338   :  { %v224_v3 = vpop.xlane.xlu0 %223 }
 0x339   :  { %v232_v5 = vsel %vm231_vm15, %v224_v3, %v230_v2 }
 0x33a   :  { %v235_v6 = vsel %vm233_vm0, %v234_v4, %v232_v5 }
 0x33b   :  { %236 = vst [vmem:[#allocation9] sm:$0xff] %v235_v6 }
 0x33c   :  { %v305_v9 = vpop.xlane.xlu1 %304 }
 0x33d   :  { %v310_v11 = vsel %vm231_vm15, %v305_v9, %v309_v8 }
 0x33e   :  { %v312_v12 = vsel %vm233_vm0, %v311_v10, %v310_v11 }
 0x33f   :  { %313 = vst [vmem:[#allocation9 + $0x8] sm:$0xff] %v312_v12 }
 0x340   :  { %464 = shalt.err (!%p461_p10)
}
 0x341   :  { %333 = dma.vmem_to_hbm [thread:$0]  %s331_s15, 256, %s600_s5, [#allocation10]  }
 0x342   :  { %477 = dma.done.wait [#allocation4], 256  }
 0x343   :  { %478 = vsyncadd [#allocation4], 4294967040 }
 0x344   :  { %479 = dma.done.wait [#allocation10], 256  }
 0x345   :  { %480 = vsyncadd [#allocation10], 4294967040 }
 0x346   :  { %340 = vsyncpa [#allocation3], 1 }
 0x347   :  { %341 = vsyncpa [#allocation6], 1 }
 0x348   :  { %342 = vsyncpa [#allocation4], 1 }
 0x349   :  { %343 = vsyncpa [#allocation10], 1 }

</bundles_post_ra>
